<compile_context>
chip_gen: v7x
topology: tpu7x:2x2x1
jax: 0.10.0
libtpu: 0.0.40
codegen_flags: <defaults>
</compile_context>

<pallas_src>
import functools
import numpy as np
import jax
import jax.numpy as jnp
from jax import lax
from jax.experimental import pallas as pl
from jax.experimental.pallas import tpu as pltpu

_CONTRACT0 = (((0,), (0,)), ((), ()))   # contract axis 0 of both operands (A^T @ B)
_CONTRACT1 = (((1,), (1,)), ((), ()))   # contract axis 1 of both operands (A @ B^T)

# MXU input dtype for the streamed X Gram matmuls (accumulation stays f32).
_STREAM_DTYPE = jnp.bfloat16


# ------------------------------- helpers -------------------------------------

def _round_up(x, m):
    return ((x + m - 1) // m) * m


def _vmem_limit_bytes():
    """Generation-aware scoped-VMEM budget (~96 MiB v5e/v6e, ~48 MiB v7x)."""
    try:
        cap = int(pltpu.get_tpu_info().vmem_capacity_bytes)
        return int(max(32 << 20, min(cap * 3 // 4, 100 << 20)))
    except Exception:
        return 48 << 20


def _pick_col_tile(dim, pref=512):
    """Column (lane) tile: full dim if small, else a 128-multiple divisor <= 512."""
    if dim <= pref:
        return dim
    for t in (pref, 512, 256, 128):
        if dim % t == 0:
            return t
    return 128   # padded dims here are always multiples of 128


def _pick_rows(n):
    """(padded N, row tile): sublane-aligned, tiled only when N is large."""
    if n <= 1024:
        npad = _round_up(max(n, 8), 8)
        return npad, npad
    tn = 1024 if n >= 4096 else 512
    return _round_up(n, tn), tn


# ------------------------------ Pallas kernels --------------------------------

def _means_kernel(x_ref, oh_ref, invc_ref, xcm_ref, mean_ref, csum, gsum,
                  *, n_samples, n_steps):
    """Per-class means and global mean, tiled over both D and N."""
    n = pl.program_id(1)

    @pl.when(n == 0)
    def _():
        csum[...] = jnp.zeros_like(csum)
        gsum[...] = jnp.zeros_like(gsum)

    X = x_ref[...]                                   # (tn, td)
    csum[...] += lax.dot_general(oh_ref[...], X, _CONTRACT0,
                                 preferred_element_type=jnp.float32)
    gsum[...] += jnp.sum(X, axis=0, keepdims=True)

    @pl.when(n == n_steps - 1)
    def _():
        xcm_ref[...] = csum[...] * invc_ref[...]
        mean_ref[...] = gsum[...] * (1.0 / n_samples)


def _scatter_kernel(si_ref, sj_ref, xi_ref, xj_ref, w_ref, cmi_ref, cmj_ref,
                    ssw_ref, ssb_ref, swreg_ref, sb_ref, g_acc, gw_acc,
                    *, n_samples, n_classes, lamb, td, k_steps):
    """Sw_reg (= Sw/C + lamb*I) and Sb for one upper-triangular (i, j) tile pair,
    streaming X once over the N stripes (Gram + rank-correction form)."""
    t = pl.program_id(0)          # upper-triangular tile-pair index
    k = pl.program_id(1)          # N-stripe (reduction) index
    i_blk = si_ref[t]
    j_blk = sj_ref[t]

    @pl.when(k == 0)
    def _():
        g_acc[...] = jnp.zeros_like(g_acc)
        gw_acc[...] = jnp.zeros_like(gw_acc)

    xi = xi_ref[...]                                  # (tn, td) f32, column block i
    xj = xj_ref[...].astype(_STREAM_DTYPE)            # (tn, td), column block j
    w = w_ref[...]                                    # (tn, 1)   1/(N_{y_i}-1), 0 on pad rows
    g_acc[...] += lax.dot_general(xi.astype(_STREAM_DTYPE), xj, _CONTRACT0,
                                  preferred_element_type=jnp.float32)
    gw_acc[...] += lax.dot_general((xi * w).astype(_STREAM_DTYPE), xj, _CONTRACT0,
                                   preferred_element_type=jnp.float32)

    @pl.when(k == k_steps - 1)
    def _():
        # cm* rows: [Xc_mean (C rows); global mean; zero padding to 8*ceil((C+1)/8)]
        cmi = cmi_ref[...]
        cmj = cmj_ref[...]
        # Sw correction: scale rows by [Nc/(Nc-1), ..., 0, 0...]
        corr_sw = lax.dot_general(cmi * ssw_ref[...], cmj, _CONTRACT0,
                                  preferred_element_type=jnp.float32)
        # Sb correction (class term / C and the -N/(N-1)*m*m^T term fused into
        # one matmul via the per-row scale vector; no K=1 MXU matmul).
        corr_sb = lax.dot_general(cmi * ssb_ref[...], cmj, _CONTRACT0,
                                  preferred_element_type=jnp.float32)
        sw = (gw_acc[...] - corr_sw) * (1.0 / n_classes)
        sb = (g_acc[...] * (1.0 / (n_samples - 1))
              - gw_acc[...] * (1.0 / n_classes) + corr_sb)
        # + lamb on the *global* diagonal; the mask is all-zero on off-diagonal
        # tile pairs, so no nested pl.when / program_id is needed.
        rows = i_blk * td + lax.broadcasted_iota(jnp.int32, (td, td), 0)
        cols = j_blk * td + lax.broadcasted_iota(jnp.int32, (td, td), 1)
        swreg_ref[...] = sw + (rows == cols).astype(jnp.float32) * lamb
        sb_ref[...] = sb


def _matmul_nn_kernel(a_ref, b_ref, o_ref, acc_ref, *, k_steps):
    k = pl.program_id(2)

    @pl.when(k == 0)
    def _():
        acc_ref[...] = jnp.zeros_like(acc_ref)

    acc_ref[...] += jnp.dot(a_ref[...], b_ref[...],
                            preferred_element_type=jnp.float32)

    @pl.when(k == k_steps - 1)
    def _():
        o_ref[...] = acc_ref[...]


def _matmul_nt_kernel(a_ref, b_ref, o_ref, acc_ref, *, k_steps):
    # A @ B^T without materializing the transpose.
    k = pl.program_id(2)

    @pl.when(k == 0)
    def _():
        acc_ref[...] = jnp.zeros_like(acc_ref)

    acc_ref[...] += lax.dot_general(a_ref[...], b_ref[...], _CONTRACT1,
                                    preferred_element_type=jnp.float32)

    @pl.when(k == k_steps - 1)
    def _():
        o_ref[...] = acc_ref[...]


# ---------------------------- pallas_call wrappers -----------------------------

def _means_call(Xp, onehot_p, invc_col, n_samples, tn):
    Np, Dp = Xp.shape
    C = onehot_p.shape[1]
    td = _pick_col_tile(Dp, 512)
    n_steps = Np // tn
    kernel = functools.partial(_means_kernel, n_samples=n_samples, n_steps=n_steps)
    return pl.pallas_call(
        kernel,
        out_shape=(jax.ShapeDtypeStruct((C, Dp), jnp.float32),   # Xc_mean
                   jax.ShapeDtypeStruct((1, Dp), jnp.float32)),  # global mean
        grid=(Dp // td, n_steps),
        in_specs=[pl.BlockSpec((tn, td), lambda d, n: (n, d)),
                  pl.BlockSpec((tn, C), lambda d, n: (n, 0)),
                  pl.BlockSpec((C, 1), lambda d, n: (0, 0))],
        out_specs=(pl.BlockSpec((C, td), lambda d, n: (0, d)),
                   pl.BlockSpec((1, td), lambda d, n: (0, d))),
        scratch_shapes=[pltpu.VMEM((C, td), jnp.float32),
                        pltpu.VMEM((1, td), jnp.float32)],
        compiler_params=pltpu.CompilerParams(
            dimension_semantics=("parallel", "arbitrary"),
            vmem_limit_bytes=_vmem_limit_bytes()),
    )(Xp, onehot_p, invc_col)


def _scatter_call(Xp, wvec, CM, s_sw, s_sb, n_samples, n_classes, lamb, tn):
    Np, Dp = Xp.shape
    cm_rows = CM.shape[0]
    td = _pick_col_tile(Dp, 512)          # <=512: fits v7x (64 MiB) and is MXU-bound on v6e
    nt = Dp // td
    k_steps = Np // tn

    # Upper-triangular tile-pair enumeration (Sw / Sb are symmetric).
    pairs = [(i, j) for i in range(nt) for j in range(i, nt)]
    si = jnp.asarray(np.array([p[0] for p in pairs], dtype=np.int32))
    sj = jnp.asarray(np.array([p[1] for p in pairs], dtype=np.int32))

    kernel = functools.partial(_scatter_kernel, n_samples=n_samples,
                               n_classes=n_classes, lamb=float(lamb),
                               td=td, k_steps=k_steps)
    grid_spec = pltpu.PrefetchScalarGridSpec(
        num_scalar_prefetch=2,
        grid=(len(pairs), k_steps),
        in_specs=[
            pl.BlockSpec((tn, td), lambda t, k, si, sj: (k, si[t])),       # X, i columns
            pl.BlockSpec((tn, td), lambda t, k, si, sj: (k, sj[t])),       # X, j columns
            pl.BlockSpec((tn, 1), lambda t, k, si, sj: (k, 0)),            # per-row 1/(Nc-1)
            pl.BlockSpec((cm_rows, td), lambda t, k, si, sj: (0, si[t])),  # [Xc_mean; mean], i cols
            pl.BlockSpec((cm_rows, td), lambda t, k, si, sj: (0, sj[t])),  # [Xc_mean; mean], j cols
            pl.BlockSpec((cm_rows, 1), lambda t, k, si, sj: (0, 0)),       # Sw row scales
            pl.BlockSpec((cm_rows, 1), lambda t, k, si, sj: (0, 0)),       # Sb row scales
        ],
        out_specs=(
            pl.BlockSpec((td, td), lambda t, k, si, sj: (si[t], sj[t])),
            pl.BlockSpec((td, td), lambda t, k, si, sj: (si[t], sj[t])),
        ),
        scratch_shapes=[pltpu.VMEM((td, td), jnp.float32),
                        pltpu.VMEM((td, td), jnp.float32)],
    )
    return pl.pallas_call(
        kernel,
        out_shape=(jax.ShapeDtypeStruct((Dp, Dp), jnp.float32),   # Sw/C + lamb*I (upper tiles)
                   jax.ShapeDtypeStruct((Dp, Dp), jnp.float32)),  # Sb           (upper tiles)
        grid_spec=grid_spec,
        compiler_params=pltpu.CompilerParams(
            dimension_semantics=("parallel", "arbitrary"),
            vmem_limit_bytes=_vmem_limit_bytes()),
    )(si, sj, Xp, Xp, wvec, CM, CM, s_sw, s_sb)


def _matmul_nn(a, b, pref=512):
    M, K = a.shape
    _, Nn = b.shape
    tm, tn, tk = _pick_col_tile(M, pref), _pick_col_tile(Nn, pref), _pick_col_tile(K, pref)
    kernel = functools.partial(_matmul_nn_kernel, k_steps=K // tk)
    return pl.pallas_call(
        kernel,
        out_shape=jax.ShapeDtypeStruct((M, Nn), jnp.float32),
        grid=(M // tm, Nn // tn, K // tk),
        in_specs=[pl.BlockSpec((tm, tk), lambda i, j, k: (i, k)),
                  pl.BlockSpec((tk, tn), lambda i, j, k: (k, j))],
        out_specs=pl.BlockSpec((tm, tn), lambda i, j, k: (i, j)),
        scratch_shapes=[pltpu.VMEM((tm, tn), jnp.float32)],
        compiler_params=pltpu.CompilerParams(
            dimension_semantics=("parallel", "parallel", "arbitrary"),
            vmem_limit_bytes=_vmem_limit_bytes()),
    )(a, b)


def _matmul_nt(a, b, pref=512):
    # a: (M, K), b: (N, K)  ->  a @ b.T
    M, K = a.shape
    Nn, _ = b.shape
    tm, tn, tk = _pick_col_tile(M, pref), _pick_col_tile(Nn, pref), _pick_col_tile(K, pref)
    kernel = functools.partial(_matmul_nt_kernel, k_steps=K // tk)
    return pl.pallas_call(
        kernel,
        out_shape=jax.ShapeDtypeStruct((M, Nn), jnp.float32),
        grid=(M // tm, Nn // tn, K // tk),
        in_specs=[pl.BlockSpec((tm, tk), lambda i, j, k: (i, k)),
                  pl.BlockSpec((tn, tk), lambda i, j, k: (j, k))],
        out_specs=pl.BlockSpec((tm, tn), lambda i, j, k: (i, j)),
        scratch_shapes=[pltpu.VMEM((tm, tn), jnp.float32)],
        compiler_params=pltpu.CompilerParams(
            dimension_semantics=("parallel", "parallel", "arbitrary"),
            vmem_limit_bytes=_vmem_limit_bytes()),
    )(a, b)


def _mirror_upper(m):
    """Rebuild a full symmetric matrix from its (tile-wise) upper triangle."""
    return jnp.triu(m) + jnp.triu(m, 1).T


# ---------------------------------- module -------------------------------------

class LDA:
    def __init__(self, n_classes, lamb):
        self.n_classes = n_classes
        self.n_components = n_classes - 1
        self.lamb = float(lamb)

    def forward(self, X, y):
        N = X.shape[0]
        Xf = jnp.reshape(X, (N, -1)).astype(jnp.float32)   # torch: X.view(N, -1)
        D = Xf.shape[1]
        C = self.n_classes

        y_np = np.asarray(y).astype(np.int64)
        labels, counts = np.unique(y_np, return_counts=True)
        assert len(labels) == C
        counts_f = counts.astype(np.float32)
        # NOTE: classes with a single sample give 1/(Nc-1)=inf (matches torch).

        # ---- (8,128)-aligned padded shapes; all Pallas work runs on these ----
        Dp = _round_up(D, 128)
        Np, tn = _pick_rows(N)
        Xp = jnp.pad(Xf, ((0, Np - N), (0, Dp - D)))

        y_dev = jnp.asarray(y_np.astype(np.int32))
        onehot = (y_dev[:, None] == jnp.arange(C, dtype=jnp.int32)[None, :]
                  ).astype(jnp.float32)                                  # (N, C)
        onehot_p = jnp.pad(onehot, ((0, Np - N), (0, 0)))
        invc_col = jnp.asarray((1.0 / counts_f).reshape(C, 1), dtype=jnp.float32)

        # Per-row weight 1/(N_{y_i}-1); zero on padded rows.
        w_per_class = 1.0 / (counts_f - 1.0)
        wvec_np = np.zeros((Np, 1), dtype=np.float32)
        wvec_np[:N, 0] = w_per_class[y_np]
        wvec = jnp.asarray(wvec_np)

        # ---- Pallas: per-class means + global mean (tiled over D and N) ----
        Xc_mean_p, mean_p = _means_call(Xp, onehot_p, invc_col, N, tn)

        # Combined correction operand: [Xc_mean rows; global mean; zero pad to 8k rows]
        cm_rows = _round_up(C + 1, 8)
        CM = jnp.concatenate(
            [Xc_mean_p, mean_p,
             jnp.zeros((cm_rows - C - 1, Dp), jnp.float32)], axis=0)     # (cm_rows, Dp)
        ncw = counts_f / (counts_f - 1.0)
        s_sw_np = np.zeros((cm_rows, 1), np.float32)
        s_sw_np[:C, 0] = ncw
        s_sb_np = np.zeros((cm_rows, 1), np.float32)
        s_sb_np[:C, 0] = ncw / C
        s_sb_np[C, 0] = -(float(N) / (N - 1.0))
        s_sw = jnp.asarray(s_sw_np)
        s_sb = jnp.asarray(s_sb_np)

        # ---- Pallas: Sw_reg and Sb, upper-triangular tiles only, one X stream ----
        Sw_u, Sb_u = _scatter_call(Xp, wvec, CM, s_sw, s_sb, N, C, self.lamb, tn)
        Sb_p = _mirror_upper(Sb_u)                       # padded, for the big matmul
        Sw_reg = _mirror_upper(Sw_u[:D, :D])             # true-D, for pinv

        # ---- pseudo-inverse (SVD, plain JAX/XLA) + Pallas tiled matmul ----
        Sw_pinv = jnp.linalg.pinv(Sw_reg)
        Sw_pinv_p = jnp.pad(Sw_pinv, ((0, Dp - D), (0, Dp - D)))
        temp_p = _matmul_nn(Sw_pinv_p, Sb_p)

        # TODO(synk): general (non-symmetric) eigendecomposition (torch.eig) has no
        # Pallas/TPU equivalent; computed on host with numpy, matching torch.eig's
        # real-eigenvalue filtering + ascending-sort semantics.
        temp_np = np.asarray(jax.device_get(temp_p))[:D, :D].astype(np.float32)
        ev, V = np.linalg.eig(temp_np)
        real_mask = ev.imag == 0
        evals = np.asarray(ev.real[real_mask], dtype=np.float32)
        evecs = np.asarray(V[:, real_mask].real, dtype=np.float32)
        order = np.argsort(evals)
        evals = evals[order]
        evecs = evecs[:, order]
        hasComplexEVal = bool(evecs.shape[1] < evecs.shape[0])

        # Pad eigenvector *count* only to a lane-aligned width (not to D x D).
        r = evecs.shape[1]
        r_pad = max(_round_up(max(r, 1), 128), 128)
        V_p_np = np.zeros((Dp, r_pad), dtype=np.float32)
        V_p_np[:D, :r] = evecs
        V_p = jnp.asarray(V_p_np)

        # ---- Pallas: coef_ = (Xc_mean @ V) @ V^T   (reassociated) ----
        T = _matmul_nn(Xc_mean_p, V_p)        # (C, r_pad)
        coef_p = _matmul_nt(T, V_p)           # (C, Dp)
        coef = coef_p[:, :D]
        Xc_mean = Xc_mean_p[:, :D]

        self.scalings_ = jnp.asarray(evecs)
        self.coef_ = coef
        # intercept_ = -0.5 * diag(Xc_mean @ coef^T): trivial elementwise rowsum.
        self.intercept_ = -0.5 * jnp.sum(Xc_mean * coef, axis=1)
        return hasComplexEVal, jnp.asarray(evals)

    def transform(self, X):
        Xf = jnp.reshape(X, (X.shape[0], -1)).astype(jnp.float32)
        X_new = Xf @ self.scalings_
        return X_new[:, :self.n_components]

    def predict(self, X):
        Xf = jnp.reshape(X, (X.shape[0], -1)).astype(jnp.float32)
        logit = Xf @ self.coef_.T + self.intercept_
        return jnp.argmax(logit, axis=1)


# ----------------------------------- main ---------------------------------------

if __name__ == "__main__":
    key = jax.random.PRNGKey(0)
    n_classes = 3
    lamb = 1e-3

    # NCHW input, flattened inside forward: N=12, C=4, H=4, W=4 -> D=64
    X = jax.random.normal(key, (12, 4, 4, 4), dtype=jnp.float32)
    y = jnp.array([0, 1, 2] * 4, dtype=jnp.int32)   # 4 samples per class

    model = LDA(n_classes=n_classes, lamb=lamb)
    hasComplexEVal, evals = model.forward(X, y)

    jax.block_until_ready(evals)
    jax.block_until_ready(model.coef_)
    jax.block_until_ready(model.intercept_)

    assert model.coef_.shape == (n_classes, 64)
    assert model.intercept_.shape == (n_classes,)
    assert evals.ndim == 1
    assert isinstance(hasComplexEVal, bool)
    assert bool(jnp.all(jnp.isfinite(model.coef_)))
    assert bool(jnp.all(jnp.isfinite(model.intercept_)))

    print("KERNEL_OK")
</pallas_src>

<mosaic_0001>
module attributes {stable_mosaic.version = 11 : i64} {
  func.func @_means_kernel(%arg0: i32, %arg1: i32, %arg2: memref<16x128xf32, #tpu.memory_space<vmem>>, %arg3: memref<16x3xf32, #tpu.memory_space<vmem>>, %arg4: memref<3x1xf32, #tpu.memory_space<vmem>>, %arg5: memref<3x128xf32, #tpu.memory_space<vmem>>, %arg6: memref<1x128xf32, #tpu.memory_space<vmem>>, %arg7: memref<3x128xf32, #tpu.memory_space<vmem>>, %arg8: memref<1x128xf32, #tpu.memory_space<vmem>>) attributes {dimension_semantics = [#tpu.dimension_semantics<parallel>, #tpu.dimension_semantics<arbitrary>], iteration_bounds = array<i64: 1, 1>, scalar_prefetch = 0 : i64, scratch_operands = 2 : i64, tpu.core_type = #tpu.core_type<tc>, window_params = [{transform_indices = @transform_0, window_bounds = array<i64: 16, 128>}, {transform_indices = @transform_1, window_bounds = array<i64: 16, 3>}, {pipeline_mode = #tpu.pipeline_mode<synchronous>, transform_indices = @transform_2, window_bounds = array<i64: 3, 1>}, {transform_indices = @transform_3, window_bounds = array<i64: 3, 128>}, {transform_indices = @transform_4, window_bounds = array<i64: 1, 128>}]} {
    %c0_i32 = arith.constant 0 : i32
    %0 = arith.cmpi eq, %arg1, %c0_i32 : i32
    %1 = arith.extui %0 : i1 to i32
    %c0_i32_0 = arith.constant 0 : i32
    %2 = arith.cmpi ne, %1, %c0_i32_0 : i32
    scf.if %2 {
      %cst_15 = arith.constant 0.000000e+00 : f32
      %17 = vector.broadcast %cst_15 : f32 to vector<3x128xf32>
      %c0_16 = arith.constant 0 : index
      %c0_17 = arith.constant 0 : index
      %18 = vector.load %arg7[%c0_16, %c0_17] : memref<3x128xf32, #tpu.memory_space<vmem>>, vector<3x128xf32>
      tpu.vector_store %arg7[%c0_16, %c0_17], %17 {strides = array<i32>} : memref<3x128xf32, #tpu.memory_space<vmem>>, vector<3x128xf32>,
      %cst_18 = arith.constant 0.000000e+00 : f32
      %19 = vector.broadcast %cst_18 : f32 to vector<1x128xf32>
      %c0_19 = arith.constant 0 : index
      %c0_20 = arith.constant 0 : index
      %20 = vector.load %arg8[%c0_19, %c0_20] : memref<1x128xf32, #tpu.memory_space<vmem>>, vector<1x128xf32>
      tpu.vector_store %arg8[%c0_19, %c0_20], %19 {strides = array<i32>} : memref<1x128xf32, #tpu.memory_space<vmem>>, vector<1x128xf32>,
    } else {
    }
    %c0 = arith.constant 0 : index
    %c0_1 = arith.constant 0 : index
    %3 = vector.load %arg2[%c0, %c0_1] : memref<16x128xf32, #tpu.memory_space<vmem>>, vector<16x128xf32>
    %c0_2 = arith.constant 0 : index
    %c0_3 = arith.constant 0 : index
    %4 = vector.load %arg7[%c0_2, %c0_3] : memref<3x128xf32, #tpu.memory_space<vmem>>, vector<3x128xf32>
    %c0_4 = arith.constant 0 : index
    %c0_5 = arith.constant 0 : index
    %5 = vector.load %arg3[%c0_4, %c0_5] : memref<16x3xf32, #tpu.memory_space<vmem>>, vector<16x3xf32>
    %cst = arith.constant dense<0.000000e+00> : vector<3x128xf32>
    %6 = tpu.matmul %5, %3, %cst {dimension_numbers = #tpu.dot_dimension_numbers<[0], [0], [1], [1], [0, 1, 1, 1], [], []>} : vector<16x3xf32>, vector<16x128xf32>, vector<3x128xf32> -> vector<3x128xf32>
    %7 = arith.addf %4, %6 : vector<3x128xf32>
    %c0_6 = arith.constant 0 : index
    %c0_7 = arith.constant 0 : index
    %8 = vector.load %arg7[%c0_6, %c0_7] : memref<3x128xf32, #tpu.memory_space<vmem>>, vector<3x128xf32>
    tpu.vector_store %arg7[%c0_6, %c0_7], %7 {strides = array<i32>} : memref<3x128xf32, #tpu.memory_space<vmem>>, vector<3x128xf32>,
    %c0_8 = arith.constant 0 : index
    %c0_9 = arith.constant 0 : index
    %9 = vector.load %arg8[%c0_8, %c0_9] : memref<1x128xf32, #tpu.memory_space<vmem>>, vector<1x128xf32>
    %cst_10 = arith.constant dense<0.000000e+00> : vector<128xf32>
    %10 = vector.multi_reduction <add>, %3, %cst_10 [0] : vector<16x128xf32> to vector<128xf32>
    %11 = vector.shape_cast %10 : vector<128xf32> to vector<1x128xf32>
    %12 = arith.addf %9, %11 : vector<1x128xf32>
    %c0_11 = arith.constant 0 : index
    %c0_12 = arith.constant 0 : index
    %13 = vector.load %arg8[%c0_11, %c0_12] : memref<1x128xf32, #tpu.memory_space<vmem>>, vector<1x128xf32>
    tpu.vector_store %arg8[%c0_11, %c0_12], %12 {strides = array<i32>} : memref<1x128xf32, #tpu.memory_space<vmem>>, vector<1x128xf32>,
    %c0_i32_13 = arith.constant 0 : i32
    %14 = arith.cmpi eq, %arg1, %c0_i32_13 : i32
    %15 = arith.extui %14 : i1 to i32
    %c0_i32_14 = arith.constant 0 : i32
    %16 = arith.cmpi ne, %15, %c0_i32_14 : i32
    scf.if %16 {
      %c0_15 = arith.constant 0 : index
      %c0_16 = arith.constant 0 : index
      %17 = vector.load %arg7[%c0_15, %c0_16] : memref<3x128xf32, #tpu.memory_space<vmem>>, vector<3x128xf32>
      %c0_17 = arith.constant 0 : index
      %c0_18 = arith.constant 0 : index
      %18 = vector.load %arg4[%c0_17, %c0_18] : memref<3x1xf32, #tpu.memory_space<vmem>>, vector<3x1xf32>
      %19 = vector.broadcast %18 : vector<3x1xf32> to vector<3x128xf32>
      %20 = arith.mulf %17, %19 : vector<3x128xf32>
      %c0_19 = arith.constant 0 : index
      %c0_20 = arith.constant 0 : index
      %21 = vector.load %arg5[%c0_19, %c0_20] : memref<3x128xf32, #tpu.memory_space<vmem>>, vector<3x128xf32>
      tpu.vector_store %arg5[%c0_19, %c0_20], %20 {strides = array<i32>} : memref<3x128xf32, #tpu.memory_space<vmem>>, vector<3x128xf32>,
      %c0_21 = arith.constant 0 : index
      %c0_22 = arith.constant 0 : index
      %22 = vector.load %arg8[%c0_21, %c0_22] : memref<1x128xf32, #tpu.memory_space<vmem>>, vector<1x128xf32>
      %cst_23 = arith.constant 0.0833333358 : f32
      %23 = vector.broadcast %cst_23 : f32 to vector<1x128xf32>
      %24 = arith.mulf %22, %23 : vector<1x128xf32>
      %c0_24 = arith.constant 0 : index
      %c0_25 = arith.constant 0 : index
      %25 = vector.load %arg6[%c0_24, %c0_25] : memref<1x128xf32, #tpu.memory_space<vmem>>, vector<1x128xf32>
      tpu.vector_store %arg6[%c0_24, %c0_25], %24 {strides = array<i32>} : memref<1x128xf32, #tpu.memory_space<vmem>>, vector<1x128xf32>,
    } else {
    }
    return
  }
  func.func @transform_0(%arg0: i32, %arg1: i32) -> (i32, i32) {
    %c0_i32 = arith.constant 0 : i32
    return %arg1, %arg0 : i32, i32
  }
  func.func @transform_1(%arg0: i32, %arg1: i32) -> (i32, i32) {
    %c0_i32 = arith.constant 0 : i32
    %c0_i32_0 = arith.constant 0 : i32
    return %arg1, %c0_i32 : i32, i32
  }
  func.func @transform_2(%arg0: i32, %arg1: i32) -> (i32, i32) {
    %c0_i32 = arith.constant 0 : i32
    %c0_i32_0 = arith.constant 0 : i32
    %c0_i32_1 = arith.constant 0 : i32
    return %c0_i32, %c0_i32_0 : i32, i32
  }
  func.func @transform_3(%arg0: i32, %arg1: i32) -> (i32, i32) {
    %c0_i32 = arith.constant 0 : i32
    %c0_i32_0 = arith.constant 0 : i32
    return %c0_i32, %arg0 : i32, i32
  }
  func.func @transform_4(%arg0: i32, %arg1: i32) -> (i32, i32) {
    %c0_i32 = arith.constant 0 : i32
    %c0_i32_0 = arith.constant 0 : i32
    return %c0_i32, %arg0 : i32, i32
  }
}

</mosaic_0001>

<bundles_post_ra>
// kernel: tpu_custom_call.1
= control target key start
LH: loop header
LB: loop body
LE: loop exit
PB: predicated region body
PF: predicated region fallthrough
CT: control target
= control target key end

     0   :  { %10 = vsyncpa [#allocation5], 0  ;;  %v260_v2 = vmov 0.0|0.0   ;;  %v261_v4 = vmov 0.0   ;;  %s330_s0 = inlined_call_operand.vmem [shape: f32[16,128], index: 0, kind: input, shape index: {}]   ;;  %s331_s1 = inlined_call_operand.vmem [shape: f32[16,3], index: 1, kind: input, shape index: {}]   ;;  %s332_s2 = inlined_call_operand.vmem [shape: f32[3,1], index: 2, kind: input, shape index: {}]   ;;  %s333_s3 = inlined_call_operand.hbm [shape: f32[3,128], index: 3, kind: output, shape index: {0}]   ;;  %s334_s4 = inlined_call_operand.hbm [shape: f32[1,128], index: 4, kind: output, shape index: {1}]  }
   0x1   :  { %v27_v0 = vld [vmem:[%s331_s1] sm:$0xff]  ;;  %201 = vmatprep.subr.bf16.mxu0 %v260_v2  ;;  %v25_v3 = vld [vmem:[%s330_s0 + $0x8] sm:$0xff]  ;;  %22 = vst [vmem:[#allocation2] sm:$0x7] %v261_v4  ;;  %23 = vst [vmem:[#allocation3] sm:$0x1] %v261_v4 }
   0x2   :  { %v24_v1 = vld [vmem:[%s330_s0] sm:$0xff]  ;;  %29 = vxpose.xlu0.b32.start [1/2] (short) (narrow) %v27_v0, 8 }
   0x3   :  { %11 = vsyncpa [#allocation7], 0  ;;  %v28_v5 = vld [vmem:[%s331_s1 + $0x8] sm:$0xff]  ;;  %v202_v6 = vpack.c.bf16 %v25_v3, %v24_v1  ;;  %v138_v7 = vadd.f32 %v25_v3, %v24_v1  ;;  %vm262_vm0 = vmmov 0   ;;  %v151_v8 = vld [vmem:[%s332_s2] sm:$0x7] }
   0x4   :  { %198 = vmatprep.mubr.msk.f32.mxu0 %vm262_vm0, %v261_v4  ;;  %v263_v9 = vmov 0   ;;  %vm61_vm1 = vcmask 130048   ;;  %s264_s0 = smov [#allocation6]  }
   0x5   :  { %210 = vset.pattern.permute.xlu1 %v263_v9  ;;  %203 = vmatpush3.bf16.msra.mxu0 %v202_v6  ;;  %v139_v10 = vrot.slane %v138_v7, 4  ;;  %s178_s1 = sshll.u32 %s264_s0, 4  ;;  %s179_s1 = int_to_ptr.vmem [resolvable:$true] %s178_s1 }
   0x6   :  { %154 = vperm.xlu1 %210, %v151_v8   ;;  %30 = vxpose.xlu0.b32.end [2/2] (short) (narrow) %v28_v5, 8  ;;  %s212_s2 = scalar_lea.vmem %s179_s1, 16  ;;  %s216_s25 = scalar_lea.vmem %s179_s1, 32 }
   0x7   :  { %v140_v11 = vadd.f32 %v139_v10, %v138_v7  ;;  %p213_p0 = scmp.ne.s32.totalorder %s179_s1, %s212_s2  ;;  %p217_p1 = scmp.lt.s32.totalorder %s179_s1, %s179_s1 }
   0x8   :  { %v137_v15 = vld [vmem:[#allocation3] sm:$0x1]  ;;  %p218_p2 = scmp.lt.s32.totalorder %s216_s25, %s212_s2 }
   0x9   :  { %v141_v12 = vrot.slane %v140_v11, 2 }
   0xa   :  { %p219_p3 = por %p218_p2, %p217_p1 }
   0xb   :  { %v142_v13 = vadd.f32 %v141_v12, %v140_v11 }
   0xc   :  { %p220_p4 = pnand %p219_p3, %p213_p0 }
   0xd   :  { %v143_v14 = vrot.slane %v142_v13, 1 }
   0xf   :  { %v144_v16 = vadd.f32 %v143_v14, %v142_v13 }
  0x11   :  { %v145_v17 = vadd.f32 %v144_v16, %v137_v15 }
  0x13   :  { %146 = vst [vmem:[#allocation3] sm:$0x1] %v145_v17 }
  0x1a   :  { %v159_v19 = vld [vmem:[#allocation3] sm:$0x1] }
  0x1b   :  { %v160_v20 = vmul.f32 0.083333336, %v159_v19 }
  0x1d   :  { %161 = vst [vmem:[#allocation6] sm:$0x1] %v160_v20 }
  0x2f   :  { %211 = vset.pattern.permute.xlu0 %v263_v9 }
  0x82   :  { %v45_v18 = vpop.trf.xlu0 }
  0x83   :  { %199 = vmatmul.mubr.msk.f32.vlgmr.msra.gmra.mrb[0].mxu0 %vm61_vm1, %v45_v18 }
  0x84   :  { %223 = shalt.err (!%p220_p4)
}
  0x85   :  { %s224_s28 = scalar_lea.hbm %s334_s4, 16 }
  0x86   :  { %p225_p5 = scmp.ne.s32.totalorder %s334_s4, %s224_s28  ;;  %p228_p6 = scmp.lt.u32.totalorder %s224_s28, %s334_s4 }
  0x88   :  { %p230_p7 = pnand %p228_p6, %p225_p5 }
  0x8a   :  { %233 = shalt.err (!%p230_p7)
}
  0x8b   :  { %181 = dma.vmem_to_hbm [thread:$0]  %s179_s1, 16, %s334_s4, [#allocation7]   ;;  %v26_v21 = vld [vmem:[#allocation2] sm:$0x7]  ;;  %v155_v25 = vpop.permute.xlu1 %154 }
  0x8c   :  { %s265_s9 = smov [#allocation4]  }
  0x8d   :  { %s168_s10 = sshll.u32 %s265_s9, 4  ;;  %s169_s10 = int_to_ptr.vmem [resolvable:$true] %s168_s10 }
  0x8e   :  { %s234_s11 = scalar_lea.vmem %s169_s10, 64  ;;  %p239_p9 = scmp.lt.s32.totalorder %s169_s10, %s169_s10 }
  0x8f   :  { %p235_p8 = scmp.ne.s32.totalorder %s169_s10, %s234_s11  ;;  %p240_p10 = scmp.lt.s32.totalorder %s234_s11, %s234_s11 }
  0x91   :  { %p241_p11 = por %p240_p10, %p239_p9 }
  0x93   :  { %p242_p12 = pnand %p241_p11, %p235_p8 }
 0x156   :  { %v131_v22 = vpop.f32.mrb[0].mxu0 }
 0x157   :  { %v135_v23 = vadd.f32 %v131_v22, %v26_v21  ;;  %v200_v24 = vpop.f32.mrb[1].mxu0 }
 0x159   :  { %136 = vst [vmem:[#allocation2] sm:$0x7] %v135_v23 }
 0x160   :  { %v150_v26 = vld [vmem:[#allocation2] sm:$0x7] }
 0x161   :  { %v157_v27 = vmul.f32 %v155_v25, %v150_v26 }
 0x163   :  { %158 = vst [vmem:[#allocation4] sm:$0x7] %v157_v27 }
 0x164   :  { %245 = shalt.err (!%p242_p12)
}
 0x165   :  { %s246_s13 = scalar_lea.hbm %s333_s3, 64 }
 0x166   :  { %p247_p13 = scmp.ne.s32.totalorder %s333_s3, %s246_s13  ;;  %p250_p0 = scmp.lt.u32.totalorder %s246_s13, %s333_s3 }
 0x168   :  { %p252_p1 = pnand %p250_p0, %p247_p13 }
 0x16a   :  { %255 = shalt.err (!%p252_p1)
}
 0x16b   :  { %171 = dma.vmem_to_hbm [thread:$0]  %s169_s10, 64, %s333_s3, [#allocation5]  }
 0x16c   :  { %256 = dma.done.wait [#allocation5], 64  }
 0x16d   :  { %257 = vsyncadd [#allocation5], 4294967232 }
 0x16e   :  { %258 = dma.done.wait [#allocation7], 16  }
 0x16f   :  { %259 = vsyncadd [#allocation7], 4294967280 }
 0x170   :  { %188 = vsyncpa [#allocation5], 1 }
 0x171   :  { %189 = vsyncpa [#allocation7], 1 }

</bundles_post_ra>
